<compile_context>
chip_gen: v7x
topology: tpu7x:2x2x1
jax: 0.10.0
libtpu: 0.0.40
codegen_flags: <defaults>
</compile_context>

<pallas_src>
import math

import jax
import jax.numpy as jnp
import numpy as np
from jax.experimental import pallas as pl
from jax.experimental.pallas import tpu as pltpu

# ---------------- model config (small, consistent with the module) ----------------
FIELD_DIMS = (10, 20, 30, 40)          # num_fields F = 4
NUM_FIELDS = len(FIELD_DIMS)
EMBED_DIM = 16
MLP_DIMS = (32, 16)
BATCH = 2
BN_EPS = 1e-5
TILE_B = 8                             # sublane-aligned batch tile


# ---------------------------------- Pallas kernel ----------------------------------
def fnn_mlp_kernel(flat_ref,   # (TB, F*E)  flattened embeddings for this batch tile
                   wm1_ref,    # (F*E, D1)  Linear1 weight (BN-folded, transposed)
                   bm1_ref,    # (1, D1)
                   wm2_ref,    # (D1, D2)   Linear2 weight (BN-folded, transposed)
                   bm2_ref,    # (1, D2)
                   wmo_ref,    # (D2, 1)    output Linear weight (transposed)
                   bmo_ref,    # (1, 1)
                   out_ref):   # (TB, 1)
    # Linear -> (folded BN) -> ReLU, twice; Dropout is identity in eval mode.
    h1 = jnp.maximum(
        jnp.dot(flat_ref[...], wm1_ref[...], preferred_element_type=jnp.float32)
        + bm1_ref[...], 0.0)
    h2 = jnp.maximum(
        jnp.dot(h1, wm2_ref[...], preferred_element_type=jnp.float32)
        + bm2_ref[...], 0.0)
    z = jnp.dot(h2, wmo_ref[...], preferred_element_type=jnp.float32) + bmo_ref[...]
    out_ref[...] = 1.0 / (1.0 + jnp.exp(-z))                 # sigmoid (exp on EUP)


# ---------------------------------- parameters ----------------------------------
def init_params(key):
    F, E = NUM_FIELDS, EMBED_DIM
    vocab = sum(FIELD_DIMS)
    D0 = F * E
    D1, D2 = MLP_DIMS
    ks = jax.random.split(key, 8)
    p = {}
    p['offsets'] = jnp.array((0, *np.cumsum(FIELD_DIMS)[:-1]), dtype=jnp.int32)

    # FeaturesEmbedding (xavier_uniform)
    limit = math.sqrt(6.0 / (vocab + E))
    p['emb_table'] = jax.random.uniform(ks[0], (vocab, E), jnp.float32, -limit, limit)

    # MLP: Linear -> BN -> ReLU -> Dropout, twice, then Linear(->1)
    p['W1'] = 0.1 * jax.random.normal(ks[1], (D1, D0), jnp.float32)
    p['b1'] = 0.1 * jax.random.normal(ks[2], (D1,), jnp.float32)
    p['W2'] = 0.1 * jax.random.normal(ks[3], (D2, D1), jnp.float32)
    p['b2'] = 0.1 * jax.random.normal(ks[4], (D2,), jnp.float32)
    p['Wo'] = 0.1 * jax.random.normal(ks[5], (1, D2), jnp.float32)
    p['bo'] = 0.1 * jax.random.normal(ks[6], (1,), jnp.float32)
    # BatchNorm params at PyTorch defaults (gamma=1, beta=0, running mean=0, var=1)
    p['g1'], p['be1'], p['m1'], p['v1'] = (jnp.ones((D1,)), jnp.zeros((D1,)),
                                           jnp.zeros((D1,)), jnp.ones((D1,)))
    p['g2'], p['be2'], p['m2'], p['v2'] = (jnp.ones((D2,)), jnp.zeros((D2,)),
                                           jnp.zeros((D2,)), jnp.ones((D2,)))
    return p


def prepare_weights(p):
    """Fold eval-mode BatchNorm into the Linears and transpose — done ONCE, not per call."""
    def fold(W, b, gamma, beta, mean, var):
        scale = gamma / jnp.sqrt(var + BN_EPS)
        return W * scale[:, None], (b - mean) * scale + beta
    W1f, b1f = fold(p['W1'], p['b1'], p['g1'], p['be1'], p['m1'], p['v1'])
    W2f, b2f = fold(p['W2'], p['b2'], p['g2'], p['be2'], p['m2'], p['v2'])
    return {
        'wm1': jnp.asarray(W1f.T), 'bm1': jnp.asarray(b1f[None, :]),
        'wm2': jnp.asarray(W2f.T), 'bm2': jnp.asarray(b2f[None, :]),
        'wmo': jnp.asarray(p['Wo'].T), 'bmo': jnp.asarray(p['bo'][None, :]),
    }


# ---------------------------------- Pallas wrapper ----------------------------------
def fnn_pallas(idx, emb_table, offsets, w):
    F, E = NUM_FIELDS, EMBED_DIM
    D0 = F * E
    D1, D2 = MLP_DIMS
    B = idx.shape[0]

    # embedding gather + flatten (JAX glue — see TODO at top)
    ix = idx + offsets[None, :]                               # (B, F)
    flat = emb_table[ix].reshape(B, D0)                       # (B, F*E)

    # pad batch to a sublane-aligned tile
    B_pad = ((B + TILE_B - 1) // TILE_B) * TILE_B
    if B_pad != B:
        flat = jnp.pad(flat, ((0, B_pad - B), (0, 0)))
    grid = (B_pad // TILE_B,)

    out = pl.pallas_call(
        fnn_mlp_kernel,
        out_shape=jax.ShapeDtypeStruct((B_pad, 1), jnp.float32),
        grid_spec=pltpu.PrefetchScalarGridSpec(
            num_scalar_prefetch=0,
            grid=grid,
            in_specs=[
                pl.BlockSpec((TILE_B, D0), lambda i: (i, 0)),   # batch-tiled activations
                pl.BlockSpec((D0, D1), lambda i: (0, 0)),       # weights stay resident
                pl.BlockSpec((1, D1), lambda i: (0, 0)),
                pl.BlockSpec((D1, D2), lambda i: (0, 0)),
                pl.BlockSpec((1, D2), lambda i: (0, 0)),
                pl.BlockSpec((D2, 1), lambda i: (0, 0)),
                pl.BlockSpec((1, 1), lambda i: (0, 0)),
            ],
            out_specs=pl.BlockSpec((TILE_B, 1), lambda i: (i, 0)),
        ),
        compiler_params=pltpu.CompilerParams(
            dimension_semantics=("parallel",)),                 # shard batch tiles on v7x
    )(flat, w['wm1'], w['bm1'], w['wm2'], w['bm2'], w['wmo'], w['bmo'])
    return out[:B, 0]                                           # matches torch .squeeze(1)


# ---------------------------------- pure-JAX reference ----------------------------------
def fnn_reference(idx, p):
    ix = idx + p['offsets'][None, :]
    emb = p['emb_table'][ix]                                    # (B, F, E)
    flat = emb.reshape(emb.shape[0], -1)                        # (B, F*E)

    def block(x, W, b, g, be, m, v):
        y = x @ W.T + b
        y = (y - m) / jnp.sqrt(v + BN_EPS) * g + be             # eval-mode BN
        return jnp.maximum(y, 0.0)                              # ReLU (Dropout = identity)

    h1 = block(flat, p['W1'], p['b1'], p['g1'], p['be1'], p['m1'], p['v1'])
    h2 = block(h1, p['W2'], p['b2'], p['g2'], p['be2'], p['m2'], p['v2'])
    z = h2 @ p['Wo'].T + p['bo']
    return jax.nn.sigmoid(z[:, 0])


# ---------------------------------- main ----------------------------------
if __name__ == "__main__":
    key = jax.random.PRNGKey(0)
    pkey, xkey = jax.random.split(key)
    params = init_params(pkey)
    weights = prepare_weights(params)                           # BN-fold once, outside call path

    # deterministic integer inputs, one index per field, within each field's cardinality
    cols = []
    for f, fd in enumerate(FIELD_DIMS):
        xkey, sub = jax.random.split(xkey)
        cols.append(jax.random.randint(sub, (BATCH,), 0, fd, dtype=jnp.int32))
    x = jnp.stack(cols, axis=1)                                 # (B, F) int32

    fwd = jax.jit(lambda xi: fnn_pallas(xi, params['emb_table'], params['offsets'], weights))
    y_kernel = jax.block_until_ready(fwd(x))
    y_ref = jax.block_until_ready(fnn_reference(x, params))

    assert y_kernel.shape == (BATCH,)
    assert np.allclose(np.asarray(y_kernel), np.asarray(y_ref), atol=1e-4, rtol=1e-4), (
        y_kernel, y_ref)
    print("KERNEL_OK")
</pallas_src>

<mosaic_0001>
module attributes {stable_mosaic.version = 11 : i64} {
  func.func @fnn_mlp_kernel(%arg0: i32, %arg1: memref<8x64xf32, #tpu.memory_space<vmem>>, %arg2: memref<64x32xf32, #tpu.memory_space<vmem>>, %arg3: memref<1x32xf32, #tpu.memory_space<vmem>>, %arg4: memref<32x16xf32, #tpu.memory_space<vmem>>, %arg5: memref<1x16xf32, #tpu.memory_space<vmem>>, %arg6: memref<16x1xf32, #tpu.memory_space<vmem>>, %arg7: memref<1x1xf32, #tpu.memory_space<vmem>>, %arg8: memref<8x1xf32, #tpu.memory_space<vmem>>) attributes {dimension_semantics = [#tpu.dimension_semantics<parallel>], iteration_bounds = array<i64: 1>, scalar_prefetch = 0 : i64, scratch_operands = 0 : i64, tpu.core_type = #tpu.core_type<tc>, window_params = [{transform_indices = @transform_0, window_bounds = array<i64: 8, 64>}, {pipeline_mode = #tpu.pipeline_mode<synchronous>, transform_indices = @transform_1, window_bounds = array<i64: 64, 32>}, {pipeline_mode = #tpu.pipeline_mode<synchronous>, transform_indices = @transform_2, window_bounds = array<i64: 1, 32>}, {pipeline_mode = #tpu.pipeline_mode<synchronous>, transform_indices = @transform_3, window_bounds = array<i64: 32, 16>}, {pipeline_mode = #tpu.pipeline_mode<synchronous>, transform_indices = @transform_4, window_bounds = array<i64: 1, 16>}, {pipeline_mode = #tpu.pipeline_mode<synchronous>, transform_indices = @transform_5, window_bounds = array<i64: 16, 1>}, {pipeline_mode = #tpu.pipeline_mode<synchronous>, transform_indices = @transform_6, window_bounds = array<i64: 1, 1>}, {transform_indices = @transform_7, window_bounds = array<i64: 8, 1>}]} {
    %c0 = arith.constant 0 : index
    %c0_0 = arith.constant 0 : index
    %0 = vector.load %arg1[%c0, %c0_0] : memref<8x64xf32, #tpu.memory_space<vmem>>, vector<8x64xf32>
    %c0_1 = arith.constant 0 : index
    %c0_2 = arith.constant 0 : index
    %1 = vector.load %arg2[%c0_1, %c0_2] : memref<64x32xf32, #tpu.memory_space<vmem>>, vector<64x32xf32>
    %cst = arith.constant dense<0.000000e+00> : vector<8x32xf32>
    %2 = tpu.matmul %0, %1, %cst {dimension_numbers = #tpu.dot_dimension_numbers<[1], [0], [0], [1], [0, 0, 1, 1], [], []>} : vector<8x64xf32>, vector<64x32xf32>, vector<8x32xf32> -> vector<8x32xf32>
    %c0_3 = arith.constant 0 : index
    %c0_4 = arith.constant 0 : index
    %3 = vector.load %arg3[%c0_3, %c0_4] : memref<1x32xf32, #tpu.memory_space<vmem>>, vector<1x32xf32>
    %4 = vector.broadcast %3 : vector<1x32xf32> to vector<8x32xf32>
    %5 = arith.addf %2, %4 : vector<8x32xf32>
    %cst_5 = arith.constant 0.000000e+00 : f32
    %6 = vector.broadcast %cst_5 : f32 to vector<8x32xf32>
    %7 = arith.maximumf %5, %6 : vector<8x32xf32>
    %c0_6 = arith.constant 0 : index
    %c0_7 = arith.constant 0 : index
    %8 = vector.load %arg4[%c0_6, %c0_7] : memref<32x16xf32, #tpu.memory_space<vmem>>, vector<32x16xf32>
    %cst_8 = arith.constant dense<0.000000e+00> : vector<8x16xf32>
    %9 = tpu.matmul %7, %8, %cst_8 {dimension_numbers = #tpu.dot_dimension_numbers<[1], [0], [0], [1], [0, 0, 1, 1], [], []>} : vector<8x32xf32>, vector<32x16xf32>, vector<8x16xf32> -> vector<8x16xf32>
    %c0_9 = arith.constant 0 : index
    %c0_10 = arith.constant 0 : index
    %10 = vector.load %arg5[%c0_9, %c0_10] : memref<1x16xf32, #tpu.memory_space<vmem>>, vector<1x16xf32>
    %11 = vector.broadcast %10 : vector<1x16xf32> to vector<8x16xf32>
    %12 = arith.addf %9, %11 : vector<8x16xf32>
    %cst_11 = arith.constant 0.000000e+00 : f32
    %13 = vector.broadcast %cst_11 : f32 to vector<8x16xf32>
    %14 = arith.maximumf %12, %13 : vector<8x16xf32>
    %c0_12 = arith.constant 0 : index
    %c0_13 = arith.constant 0 : index
    %15 = vector.load %arg6[%c0_12, %c0_13] : memref<16x1xf32, #tpu.memory_space<vmem>>, vector<16x1xf32>
    %cst_14 = arith.constant dense<0.000000e+00> : vector<8x1xf32>
    %16 = tpu.matmul %14, %15, %cst_14 {dimension_numbers = #tpu.dot_dimension_numbers<[1], [0], [0], [1], [0, 0, 1, 1], [], []>} : vector<8x16xf32>, vector<16x1xf32>, vector<8x1xf32> -> vector<8x1xf32>
    %c0_15 = arith.constant 0 : index
    %c0_16 = arith.constant 0 : index
    %17 = vector.load %arg7[%c0_15, %c0_16] : memref<1x1xf32, #tpu.memory_space<vmem>>, vector<1x1xf32>
    %18 = vector.broadcast %17 : vector<1x1xf32> to vector<8x1xf32>
    %19 = arith.addf %16, %18 : vector<8x1xf32>
    %cst_17 = arith.constant 0.000000e+00 : f32
    %20 = vector.broadcast %cst_17 : f32 to vector<8x1xf32>
    %21 = arith.subf %20, %19 : vector<8x1xf32>
    %22 = math.exp %21 : vector<8x1xf32>
    %cst_18 = arith.constant 1.000000e+00 : f32
    %23 = vector.broadcast %cst_18 : f32 to vector<8x1xf32>
    %24 = arith.addf %23, %22 : vector<8x1xf32>
    %cst_19 = arith.constant 1.000000e+00 : f32
    %25 = vector.broadcast %cst_19 : f32 to vector<8x1xf32>
    %26 = arith.divf %25, %24 : vector<8x1xf32>
    %c0_20 = arith.constant 0 : index
    %c0_21 = arith.constant 0 : index
    %27 = vector.load %arg8[%c0_20, %c0_21] : memref<8x1xf32, #tpu.memory_space<vmem>>, vector<8x1xf32>
    tpu.vector_store %arg8[%c0_20, %c0_21], %26 {strides = array<i32>} : memref<8x1xf32, #tpu.memory_space<vmem>>, vector<8x1xf32>,
    return
  }
  func.func @transform_0(%arg0: i32) -> (i32, i32) {
    %c0_i32 = arith.constant 0 : i32
    %c0_i32_0 = arith.constant 0 : i32
    return %arg0, %c0_i32 : i32, i32
  }
  func.func @transform_1(%arg0: i32) -> (i32, i32) {
    %c0_i32 = arith.constant 0 : i32
    %c0_i32_0 = arith.constant 0 : i32
    %c0_i32_1 = arith.constant 0 : i32
    return %c0_i32, %c0_i32_0 : i32, i32
  }
  func.func @transform_2(%arg0: i32) -> (i32, i32) {
    %c0_i32 = arith.constant 0 : i32
    %c0_i32_0 = arith.constant 0 : i32
    %c0_i32_1 = arith.constant 0 : i32
    return %c0_i32, %c0_i32_0 : i32, i32
  }
  func.func @transform_3(%arg0: i32) -> (i32, i32) {
    %c0_i32 = arith.constant 0 : i32
    %c0_i32_0 = arith.constant 0 : i32
    %c0_i32_1 = arith.constant 0 : i32
    return %c0_i32, %c0_i32_0 : i32, i32
  }
  func.func @transform_4(%arg0: i32) -> (i32, i32) {
    %c0_i32 = arith.constant 0 : i32
    %c0_i32_0 = arith.constant 0 : i32
    %c0_i32_1 = arith.constant 0 : i32
    return %c0_i32, %c0_i32_0 : i32, i32
  }
  func.func @transform_5(%arg0: i32) -> (i32, i32) {
    %c0_i32 = arith.constant 0 : i32
    %c0_i32_0 = arith.constant 0 : i32
    %c0_i32_1 = arith.constant 0 : i32
    return %c0_i32, %c0_i32_0 : i32, i32
  }
  func.func @transform_6(%arg0: i32) -> (i32, i32) {
    %c0_i32 = arith.constant 0 : i32
    %c0_i32_0 = arith.constant 0 : i32
    %c0_i32_1 = arith.constant 0 : i32
    return %c0_i32, %c0_i32_0 : i32, i32
  }
  func.func @transform_7(%arg0: i32) -> (i32, i32) {
    %c0_i32 = arith.constant 0 : i32
    %c0_i32_0 = arith.constant 0 : i32
    return %arg0, %c0_i32 : i32, i32
  }
}

</mosaic_0001>

<bundles_post_ra>
// kernel: _lambda_.1
= control target key start
LH: loop header
LB: loop body
LE: loop exit
PB: predicated region body
PF: predicated region fallthrough
CT: control target
= control target key end

     0   :  { %v388_v0 = vmov 0.0|0.0   ;;  %vm389_vm0 = vmmov 0   ;;  %v390_v4 = vmov 0.0   ;;  %vm44_vm1 = vcmask 523264   ;;  %s491_s1 = inlined_call_operand.vmem [shape: f32[64,32], index: 1, kind: input, shape index: {}]   ;;  %s492_s3 = inlined_call_operand.vmem [shape: f32[32,16], index: 3, kind: input, shape index: {}]   ;;  %s493_s0 = inlined_call_operand.vmem [shape: f32[8,64], index: 0, kind: input, shape index: {}]   ;;  %s494_s2 = inlined_call_operand.vmem [shape: f32[1,32], index: 2, kind: input, shape index: {}]   ;;  %s495_s5 = inlined_call_operand.vmem [shape: f32[16,1], index: 5, kind: input, shape index: {}]   ;;  %s496_s6 = inlined_call_operand.<no memory space> [shape: f32[1,1], index: 6, kind: input, shape index: {}]   ;;  %s497_s4 = inlined_call_operand.vmem [shape: f32[1,16], index: 4, kind: input, shape index: {}]   ;;  %s498_s7 = inlined_call_operand.vmem [shape: f32[8,1], index: 7, kind: output, shape index: {}]  }
   0x1   :  { %360 = vmatprep.subr.bf16.mxu0 %v388_v0  ;;  %v29_v1 = vld [vmem:[%s491_s1] sm:$0xff]  ;;  %v30_v2 = vld [vmem:[%s491_s1 + $0x8] sm:$0xff]  ;;  %v31_v3 = vld [vmem:[%s491_s1 + $0x10] sm:$0xff]  ;;  %339 = vmatprep.mubr.msk.f32.mxu0 %vm389_vm0, %v390_v4  ;;  %vm130_vm2 = vcmask 261120   ;;  %v12_v29 = vstv %s496_s6  ;;  %vm214_vm3 = vcmask 130048   ;;  %vm294_vm4 = vcmask 7168  }
   0x2   :  { %v361_v5 = vpack.c.bf16 %v30_v2, %v29_v1  ;;  %v32_v6 = vld [vmem:[%s491_s1 + $0x18] sm:$0xff]  ;;  %372 = vmatprep.subr.bf16.mxu1 %v388_v0  ;;  %350 = vmatprep.mubr.msk.f32.mxu1 %vm389_vm0, %v390_v4  ;;  %v119_v8 = vld [vmem:[%s492_s3] sm:$0xff]  ;;  %v120_v9 = vld [vmem:[%s492_s3 + $0x8] sm:$0xff]  ;;  %13 = vst [vmem:[#allocation2] sm:$0x1] %v12_v29 }
   0x3   :  { %v364_v7 = vpack.c.bf16 %v32_v6, %v31_v3  ;;  %v33_v10 = vld [vmem:[%s491_s1 + $0x20] sm:$0xff]  ;;  %v34_v11 = vld [vmem:[%s491_s1 + $0x28] sm:$0xff]  ;;  %v373_v12 = vpack.c.bf16 %v120_v9, %v119_v8  ;;  %v35_v14 = vld [vmem:[%s491_s1 + $0x30] sm:$0xff] }
   0x4   :  { %362 = vmatpush3.bf16.msra.mxu0 %v361_v5  ;;  %v367_v13 = vpack.c.bf16 %v34_v11, %v33_v10  ;;  %v36_v15 = vld [vmem:[%s491_s1 + $0x38] sm:$0xff]  ;;  %v28_v17 = vld [vmem:[%s493_s0] sm:$0xff]  ;;  %v121_v18 = vld [vmem:[%s492_s3 + $0x10] sm:$0xff] }
   0x5   :  { %363 = vmatprep.subr.bf16.mxu0 %v388_v0  ;;  %374 = vmatpush3.bf16.msra.mxu1 %v373_v12  ;;  %v370_v16 = vpack.c.bf16 %v36_v15, %v35_v14  ;;  %v122_v19 = vld [vmem:[%s492_s3 + $0x18] sm:$0xff]  ;;  %v300_v21 = vld [vmem:[%s494_s2] ss:$0 sm:$0xff]  ;;  %v206_v27 = vld [vmem:[%s495_s5 + $0x8] sm:$0xff] }
   0x6   :  { %375 = vmatprep.subr.bf16.mxu1 %v388_v0  ;;  %v376_v20 = vpack.c.bf16 %v122_v19, %v121_v18  ;;  %v205_v26 = vld [vmem:[%s495_s5] sm:$0xff] }
   0x7   :  { %v379_v28 = vpack.c.bf16 %v206_v27, %v205_v26  ;;  %v302_v30 = vld [vmem:[%s497_s4] ss:$0 sm:$0xff] }
   0x8   :  { %365 = vmatpush3.bf16.msra.mxu0 %v364_v7 }
   0x9   :  { %366 = vmatprep.subr.bf16.mxu0 %v388_v0  ;;  %377 = vmatpush3.bf16.msra.mxu1 %v376_v20  ;;  %v304_v35 = vld [vmem:[#allocation2] ss:$0 sm:$0xff] }
   0xa   :  { %378 = vmatprep.subr.bf16.mxu1 %v388_v0 }
   0xc   :  { %368 = vmatpush3.bf16.msra.mxu0 %v367_v13 }
   0xd   :  { %369 = vmatprep.subr.bf16.mxu0 %v388_v0 }
  0x10   :  { %371 = vmatpush3.bf16.msra.mxu0 %v370_v16 }
  0x13   :  { %340 = vmatmul.mubr.msk.f32.vlgmr.msra.gmra.mrb[0].mxu0 %vm44_vm1, %v28_v17 }
  0xe6   :  { %v114_v22 = vpop.f32.mrb[0].mxu0 }
  0xe7   :  { %v115_v23 = vadd.f32 %v300_v21, %v114_v22  ;;  %v341_v24 = vpop.f32.mrb[1].mxu0 }
  0xe9   :  { %v118_v25 = vmax.f32 %v115_v23, 0.0 }
  0xeb   :  { %351 = vmatmul.mubr.msk.f32.vlgmr.msra.gmra.mrb[0].mxu1 %vm130_vm2, %v118_v25 }
  0xec   :  { %357 = vmatprep.mubr.msk.f32.mxu1 %vm389_vm0, %v390_v4  ;;  %380 = vmatpush3.bf16.msra.mxu1 %v379_v28 }
 0x1be   :  { %v200_v31 = vpop.f32.mrb[0].mxu1 }
 0x1bf   :  { %v201_v32 = vadd.f32 %v302_v30, %v200_v31  ;;  %v352_v33 = vpop.f32.mrb[1].mxu1 }
 0x1c1   :  { %v204_v34 = vmax.f32 %v201_v32, 0.0 }
 0x1c3   :  { %358 = vmatmul.mubr.msk.f32.vlgmr.msra.gmra.mrb[2].mxu1 %vm214_vm3, %v204_v34 }
 0x296   :  { %v284_v36 = vpop.f32.mrb[2].mxu1 }
 0x297   :  { %v285_v37 = vadd.f32 %v304_v35, %v284_v36  ;;  %v359_v38 = vpop.f32.mrb[3].mxu1 }
 0x299   :  { %v288_v39 = vsub.f32 0.0, %v285_v37 }
 0x29b   :  { %v289_v40 = vmul.f32 1.442695, %v288_v39 }
 0x29d   :  { %384 = vpow2.f32 %v289_v40 }
 0x2a7   :  { %v385_v41 = vpop.eup %384 }
 0x2a8   :  { %v291_v42 = vadd.f32 1.0, %v385_v41 }
 0x2aa   :  { %386 = vrcp.f32 %v291_v42 }
 0x2b4   :  { %v387_v43 = vpop.eup %386 }
 0x2b5   :  { %295 = vst.msk [vmem:[%s498_s7] sm:$0xff] %vm294_vm4, %v387_v43 }

</bundles_post_ra>
